<compile_context>
chip_gen: v7x
topology: tpu7x:2x2x1
jax: 0.10.0
libtpu: 0.0.40
codegen_flags: <defaults>
</compile_context>

<pallas_src>
import functools

import jax
import jax.numpy as jnp
from jax import lax
from jax.experimental import pallas as pl
from jax.experimental.pallas import tpu as pltpu

NEG_INF = -1e30


# ----------------------------- linear projection ----------------------------

def _matmul_kernel(x_ref, w_ref, o_ref, acc_ref):
    @pl.when(pl.program_id(2) == 0)
    def _init():
        acc_ref[...] = jnp.zeros_like(acc_ref)

    acc_ref[...] += jnp.dot(x_ref[...], w_ref[...],
                            preferred_element_type=jnp.float32)

    @pl.when(pl.program_id(2) == pl.num_programs(2) - 1)
    def _store():
        o_ref[...] = acc_ref[...].astype(o_ref.dtype)


def linear(x, w, *, tm=512, tn=512, tk=512):
    """x: (N, K) @ w: (K, M) -> (N, M), tiled over rows/cols/contraction.

    512^3 f32 tiles = ~7 MiB/step incl. double buffering + accumulator, which
    fits the default scoped-VMEM budget on v5e/v6e/v7x.  In bf16 this halves;
    tk can then go to 1024 (raise vmem_limit_bytes accordingly).
    """
    N, K = x.shape
    K2, M = w.shape
    assert K == K2
    tm, tn, tk = min(tm, N), min(tn, M), min(tk, K)
    # TODO(synk): ragged shapes would need padding/masking; fine for demo/prod tiles.
    assert N % tm == 0 and M % tn == 0 and K % tk == 0
    return pl.pallas_call(
        _matmul_kernel,
        out_shape=jax.ShapeDtypeStruct((N, M), x.dtype),
        grid=(N // tm, M // tn, K // tk),
        in_specs=[
            pl.BlockSpec((tm, tk), lambda i, j, k: (i, k)),
            pl.BlockSpec((tk, tn), lambda i, j, k: (k, j)),
        ],
        out_specs=pl.BlockSpec((tm, tn), lambda i, j, k: (i, j)),
        scratch_shapes=[pltpu.VMEM((tm, tn), jnp.float32)],
        compiler_params=pltpu.CompilerParams(
            dimension_semantics=("parallel", "parallel", "arbitrary")),
    )(x, w)


# ------------------------------ RoPE pre-pass --------------------------------

def _rotate_half_lanes(x):
    """concat(x2, x1) -- the rotate_half sign lives in the signed sin table."""
    half = x.shape[-1] // 2
    return jnp.concatenate([x[:, half:], x[:, :half]], axis=-1)


def _rope_kernel(x_ref, cos_ref, sin_ref, o_ref, *, head_dim, heads_per_block):
    D = head_dim
    cos = cos_ref[...]          # (block_s, D)
    sin = sin_ref[...]          # (block_s, D), rotate_half sign already folded in
    for hh in range(heads_per_block):       # static unroll over heads in this block
        x = x_ref[0, :, hh * D:(hh + 1) * D]            # (block_s, D)
        o_ref[0, :, hh * D:(hh + 1) * D] = (
            x * cos + _rotate_half_lanes(x) * sin).astype(o_ref.dtype)


def _largest_divisor_leq(n, cap):
    for d in range(min(n, cap), 0, -1):
        if n % d == 0:
            return d
    return 1


def rope_prepass(qkv, cos, signed_sin, *, num_q_heads, num_kv_heads, head_dim,
                 block_s=512, max_heads_per_block=8):
    """Apply RoPE once to the Q and K columns of the qkv projection output.

    qkv: (B, S, (Hq + 2*Hkv)*D)  ->  (B, S, (Hq + Hkv)*D) rotated Q|K columns.
    V is NOT copied; the attention kernel reads V directly from `qkv`.
    """
    B, S, _ = qkv.shape
    D = head_dim
    n_rope = num_q_heads + num_kv_heads
    block_s = min(block_s, S)
    assert S % block_s == 0
    hpb = _largest_divisor_leq(n_rope, max_heads_per_block)
    n_hb = n_rope // hpb

    kernel = functools.partial(_rope_kernel, head_dim=D, heads_per_block=hpb)
    return pl.pallas_call(
        kernel,
        out_shape=jax.ShapeDtypeStruct((B, S, n_rope * D), qkv.dtype),
        grid=(B, S // block_s, n_hb),
        in_specs=[
            # Q|K columns are the first (Hq + Hkv)*D columns of qkv.
            pl.BlockSpec((1, block_s, hpb * D), lambda b, si, hb: (b, si, hb)),
            # cos/sin block index only depends on si -> not re-fetched while the
            # (fastest) head axis varies.
            pl.BlockSpec((block_s, D), lambda b, si, hb: (si, 0)),
            pl.BlockSpec((block_s, D), lambda b, si, hb: (si, 0)),
        ],
        out_specs=pl.BlockSpec((1, block_s, hpb * D), lambda b, si, hb: (b, si, hb)),
        compiler_params=pltpu.CompilerParams(
            dimension_semantics=("parallel", "parallel", "parallel")),
    )(qkv, cos, signed_sin)


# --------------------------- flash GQA attention -----------------------------

def _flash_attn_kernel(q_ref, k_ref, v_ref, o_ref,
                       m_ref, l_ref, acc_ref,
                       *, group, head_dim, block_q, block_kv):
    D = head_dim
    qi = pl.program_id(2)
    ki = pl.program_id(3)
    n_kv = pl.num_programs(3)

    @pl.when(ki == 0)
    def _init():
        m_ref[...] = jnp.full_like(m_ref, NEG_INF)
        l_ref[...] = jnp.zeros_like(l_ref)
        acc_ref[...] = jnp.zeros_like(acc_ref)

    q_start = qi * block_q
    k_start = ki * block_kv

    def body(masked):
        k = k_ref[0]                                     # (block_kv, D), RoPE'd
        v = v_ref[0]                                     # (block_kv, D)
        if masked:
            # Additive causal bias, built once per (qi, ki) step, shared by all
            # heads of the GQA group (only diagonal blocks reach this branch).
            row = q_start + lax.broadcasted_iota(jnp.int32, (block_q, block_kv), 0)
            col = k_start + lax.broadcasted_iota(jnp.int32, (block_q, block_kv), 1)
            bias = jnp.where(col <= row, jnp.float32(0.0), jnp.float32(NEG_INF))

        for g in range(group):               # static unroll over the GQA group
            # q is already RoPE'd and pre-scaled by 1/sqrt(D) (folded into wqkv).
            q_g = q_ref[0, :, g * D:(g + 1) * D]         # (block_q, D)
            s = lax.dot_general(q_g, k, (((1,), (1,)), ((), ())),
                                preferred_element_type=jnp.float32)  # (Tq, Tkv)
            if masked:
                s = s + bias

            m_prev = m_ref[g]                            # (block_q, 1)
            m_new = jnp.maximum(m_prev, jnp.max(s, axis=-1, keepdims=True))
            alpha = jnp.exp(m_prev - m_new)
            p = jnp.exp(s - m_new)

            l_ref[g] = alpha * l_ref[g] + jnp.sum(p, axis=-1, keepdims=True)
            acc_ref[g] = alpha * acc_ref[g] + jnp.dot(
                p.astype(v.dtype), v, preferred_element_type=jnp.float32)
            m_ref[g] = m_new

    # Interior blocks: fully below the diagonal -> no mask work at all.
    @pl.when(k_start + block_kv - 1 <= q_start)
    def _interior():
        body(masked=False)

    # Diagonal blocks: partially masked but still computable.
    @pl.when(jnp.logical_and(k_start <= q_start + block_q - 1,
                             k_start + block_kv - 1 > q_start))
    def _diagonal():
        body(masked=True)

    # Blocks fully above the diagonal run neither branch (and, thanks to the
    # clamped K/V index_map, also issue no DMA).

    @pl.when(ki == n_kv - 1)
    def _finalize():
        for g in range(group):
            # Exact divide: runs once per q block (off the hot loop), and avoids
            # the approx-reciprocal accuracy concern.
            inv_l = 1.0 / l_ref[g]                       # (block_q, 1)
            o_ref[0, :, g * D:(g + 1) * D] = (acc_ref[g] * inv_l).astype(o_ref.dtype)


def flash_gqa_attention(qk_roped, qkv, *, num_heads, num_kv_heads, head_dim,
                        block_q=512, block_kv=512):
    """Causal flash attention with GQA.

    qk_roped: (B, S, (Hq + Hkv)*D) -- RoPE'd (and Q pre-scaled) Q|K columns.
    qkv:      (B, S, (Hq + 2*Hkv)*D) -- original projection output (V read here).
    Returns (B, S, Hq*D) already in the layout wo expects (no transposes).

    Tuning notes: v6e/v7x (256-wide MXU) like block_q=512; v5e prefers
    block_kv=256 (single vst slot, 128-wide MXU already full at D=128).
    On v7x keep tiles moderate / prefer bf16 (64 MiB physical VMEM).
    """
    B, S, _ = qk_roped.shape
    assert num_heads % num_kv_heads == 0
    group = num_heads // num_kv_heads
    D = head_dim
    Hq, Hkv = num_heads, num_kv_heads

    block_q = min(block_q, S)
    block_kv = min(block_kv, S)
    assert S % block_q == 0 and S % block_kv == 0
    n_q, n_kv = S // block_q, S // block_kv

    def kv_block(qi, ki):
        # Last kv block that intersects the causal region of q block `qi`.
        # Clamping keeps the block index constant on skipped steps, so Pallas
        # does not issue K/V DMAs for fully-masked blocks.
        last = ((qi + 1) * block_q - 1) // block_kv
        return jnp.minimum(ki, last)

    kernel = functools.partial(
        _flash_attn_kernel, group=group, head_dim=D,
        block_q=block_q, block_kv=block_kv)

    return pl.pallas_call(
        kernel,
        out_shape=jax.ShapeDtypeStruct((B, S, Hq * D), qk_roped.dtype),
        grid=(B, Hkv, n_q, n_kv),
        in_specs=[
            # q columns of kv head h: [h*group*D, (h+1)*group*D) of qk_roped.
            pl.BlockSpec((1, block_q, group * D),
                         lambda b, h, qi, ki: (b, qi, h)),
            # k columns of kv head h: offset (Hq + h)*D of qk_roped (clamped).
            pl.BlockSpec((1, block_kv, D),
                         lambda b, h, qi, ki: (b, kv_block(qi, ki), Hq + h)),
            # v columns of kv head h: offset (Hq + Hkv + h)*D of qkv (clamped).
            pl.BlockSpec((1, block_kv, D),
                         lambda b, h, qi, ki: (b, kv_block(qi, ki), Hq + Hkv + h)),
        ],
        out_specs=pl.BlockSpec((1, block_q, group * D),
                               lambda b, h, qi, ki: (b, qi, h)),
        scratch_shapes=[
            pltpu.VMEM((group, block_q, 1), jnp.float32),   # running max
            pltpu.VMEM((group, block_q, 1), jnp.float32),   # running sum
            pltpu.VMEM((group, block_q, D), jnp.float32),   # accumulator
        ],
        # Leading axes parallel (megacore / v7x dual-TC friendly), kv reduction
        # axis innermost and arbitrary.
        compiler_params=pltpu.CompilerParams(
            dimension_semantics=("parallel", "parallel", "parallel", "arbitrary")),
    )(qk_roped, qk_roped, qkv)


# ------------------------------ glue / module -------------------------------

def internlm2_attention_forward(hidden_states, rotary_pos_emb, wqkv, wo,
                                num_heads, num_kv_heads, *,
                                block_q=512, block_kv=512):
    cos, sin = rotary_pos_emb
    B, S, H = hidden_states.shape
    D = H // num_heads
    Hq, Hkv = num_heads, num_kv_heads
    N = B * S

    # Fold 1/sqrt(D) into the Q columns of wqkv (RoPE is linear so scaling
    # commutes) -- the attention kernel then needs no in-loop scale multiply.
    # In production do this once at weight-load time.
    scale = float(D) ** -0.5
    col_scale = jnp.concatenate([
        jnp.full((Hq * D,), scale, wqkv.dtype),
        jnp.ones((2 * Hkv * D,), wqkv.dtype)])
    wqkv_scaled = wqkv * col_scale[None, :]

    x = hidden_states.reshape(N, H)                 # free (merge leading dims)
    qkv = linear(x, wqkv_scaled)                    # (N, (Hq + 2*Hkv)*D)
    qkv = qkv.reshape(B, S, -1)                     # free

    # Fold the rotate_half sign into the sin table: rotate_half(x)*sin ==
    # concat(x2, x1) * (sign * sin) with sign = [-1]*D/2 ++ [+1]*D/2.
    half = D // 2
    sign = jnp.concatenate([-jnp.ones((half,), sin.dtype),
                            jnp.ones((half,), sin.dtype)])
    signed_sin = sin * sign

    # One-shot RoPE pre-pass over the Q|K columns; V stays in `qkv` untouched.
    qk_roped = rope_prepass(qkv, cos, signed_sin,
                            num_q_heads=Hq, num_kv_heads=Hkv, head_dim=D)

    attn = flash_gqa_attention(qk_roped, qkv,
                               num_heads=Hq, num_kv_heads=Hkv, head_dim=D,
                               block_q=block_q, block_kv=block_kv)
    # attn is already (B, S, Hq*D) -> no transpose needed before wo.
    out = linear(attn.reshape(N, Hq * D), wo)       # (N, H)
    return out.reshape(B, S, H)


# --------------------------- pure-JAX reference -----------------------------

def _rotate_half(x):
    h = x.shape[-1] // 2
    return jnp.concatenate([-x[..., h:], x[..., :h]], axis=-1)


def reference_forward(hidden_states, cos, sin, wqkv, wo, num_heads, num_kv_heads):
    B, S, H = hidden_states.shape
    D = H // num_heads
    qkv = hidden_states.reshape(B * S, H) @ wqkv
    q_dim, kv_dim = num_heads * D, num_kv_heads * D
    q = qkv[:, :q_dim].reshape(B, S, num_heads, D).transpose(0, 2, 1, 3)
    k = qkv[:, q_dim:q_dim + kv_dim].reshape(B, S, num_kv_heads, D).transpose(0, 2, 1, 3)
    v = qkv[:, q_dim + kv_dim:].reshape(B, S, num_kv_heads, D).transpose(0, 2, 1, 3)

    q = q * cos + _rotate_half(q) * sin
    k = k * cos + _rotate_half(k) * sin

    group = num_heads // num_kv_heads
    k = jnp.repeat(k, group, axis=1)
    v = jnp.repeat(v, group, axis=1)

    s = jnp.einsum("bhqd,bhkd->bhqk", q, k) * (D ** -0.5)
    mask = jnp.tril(jnp.ones((S, S), bool))
    s = jnp.where(mask, s, -1e30)
    p = jax.nn.softmax(s, axis=-1)
    o = jnp.einsum("bhqk,bhkd->bhqd", p, v)
    o = o.transpose(0, 2, 1, 3).reshape(B * S, num_heads * D)
    return (o @ wo).reshape(B, S, H)


# ---------------------------------- main -------------------------------------

if __name__ == "__main__":
    # Small but realistic per-head shape (head_dim=128 so per-head column
    # blocks are lane-aligned). block_q/block_kv = 8 so the flash kv loop,
    # causal block skipping / masking branches and online-softmax rescaling
    # are all exercised.  Demo runs f32 for an exact reference check; feed
    # bf16 in production (with block_q/block_kv >= 16).
    B, S = 2, 16
    num_heads, num_kv_heads = 4, 2
    head_dim = 128
    hidden_size = num_heads * head_dim               # 512

    key = jax.random.PRNGKey(0)
    k1, k2, k3 = jax.random.split(key, 3)
    hidden_states = jax.random.normal(k1, (B, S, hidden_size), jnp.float32)

    qkv_out = (num_heads + 2 * num_kv_heads) * head_dim
    # config.bias defaults to False for InternLM2 -> no biases.
    wqkv = jax.random.normal(k2, (hidden_size, qkv_out), jnp.float32) * 0.05
    wo = jax.random.normal(k3, (num_heads * head_dim, hidden_size), jnp.float32) * 0.05

    # Rotary tables (standard rotate_half convention, shape (S, head_dim)).
    pos = jnp.arange(S, dtype=jnp.float32)
    inv_freq = 1.0 / (10000.0 ** (jnp.arange(0, head_dim, 2, dtype=jnp.float32) / head_dim))
    freqs = pos[:, None] * inv_freq[None, :]
    emb = jnp.concatenate([freqs, freqs], axis=-1)
    cos, sin = jnp.cos(emb), jnp.sin(emb)

    out = internlm2_attention_forward(hidden_states, (cos, sin), wqkv, wo,
                                      num_heads, num_kv_heads,
                                      block_q=8, block_kv=8)
    out = jax.block_until_ready(out)

    ref = reference_forward(hidden_states, cos, sin, wqkv, wo,
                            num_heads, num_kv_heads)
    assert out.shape == (B, S, hidden_size)
    err = float(jnp.max(jnp.abs(out - ref)))
    assert jnp.allclose(out, ref, atol=5e-3, rtol=5e-3), \
        f"mismatch vs reference (max err {err})"

    print("KERNEL_OK")
</pallas_src>

<mosaic_0001>
module attributes {stable_mosaic.version = 11 : i64} {
  func.func @_matmul_kernel(%arg0: i32, %arg1: i32, %arg2: i32, %arg3: memref<32x512xf32, #tpu.memory_space<vmem>>, %arg4: memref<512x512xf32, #tpu.memory_space<vmem>>, %arg5: memref<32x512xf32, #tpu.memory_space<vmem>>, %arg6: memref<32x512xf32, #tpu.memory_space<vmem>>) attributes {dimension_semantics = [#tpu.dimension_semantics<parallel>, #tpu.dimension_semantics<parallel>, #tpu.dimension_semantics<arbitrary>], iteration_bounds = array<i64: 1, 2, 1>, scalar_prefetch = 0 : i64, scratch_operands = 1 : i64, tpu.core_type = #tpu.core_type<tc>, window_params = [{transform_indices = @transform_0, window_bounds = array<i64: 32, 512>}, {transform_indices = @transform_1, window_bounds = array<i64: 512, 512>}, {transform_indices = @transform_2, window_bounds = array<i64: 32, 512>}]} {
    %c0_i32 = arith.constant 0 : i32
    %0 = arith.cmpi eq, %arg2, %c0_i32 : i32
    %1 = arith.extui %0 : i1 to i32
    %c0_i32_0 = arith.constant 0 : i32
    %2 = arith.cmpi ne, %1, %c0_i32_0 : i32
    scf.if %2 {
      %cst_10 = arith.constant 0.000000e+00 : f32
      %12 = vector.broadcast %cst_10 : f32 to vector<32x512xf32>
      %c0_11 = arith.constant 0 : index
      %c0_12 = arith.constant 0 : index
      %13 = vector.load %arg6[%c0_11, %c0_12] : memref<32x512xf32, #tpu.memory_space<vmem>>, vector<32x512xf32>
      tpu.vector_store %arg6[%c0_11, %c0_12], %12 {strides = array<i32>} : memref<32x512xf32, #tpu.memory_space<vmem>>, vector<32x512xf32>,
    } else {
    }
    %c0 = arith.constant 0 : index
    %c0_1 = arith.constant 0 : index
    %3 = vector.load %arg6[%c0, %c0_1] : memref<32x512xf32, #tpu.memory_space<vmem>>, vector<32x512xf32>
    %c0_2 = arith.constant 0 : index
    %c0_3 = arith.constant 0 : index
    %4 = vector.load %arg3[%c0_2, %c0_3] : memref<32x512xf32, #tpu.memory_space<vmem>>, vector<32x512xf32>
    %c0_4 = arith.constant 0 : index
    %c0_5 = arith.constant 0 : index
    %5 = vector.load %arg4[%c0_4, %c0_5] : memref<512x512xf32, #tpu.memory_space<vmem>>, vector<512x512xf32>
    %cst = arith.constant dense<0.000000e+00> : vector<32x512xf32>
    %6 = tpu.matmul %4, %5, %cst {dimension_numbers = #tpu.dot_dimension_numbers<[1], [0], [0], [1], [0, 0, 1, 1], [], []>} : vector<32x512xf32>, vector<512x512xf32>, vector<32x512xf32> -> vector<32x512xf32>
    %7 = arith.addf %3, %6 : vector<32x512xf32>
    %c0_6 = arith.constant 0 : index
    %c0_7 = arith.constant 0 : index
    %8 = vector.load %arg6[%c0_6, %c0_7] : memref<32x512xf32, #tpu.memory_space<vmem>>, vector<32x512xf32>
    tpu.vector_store %arg6[%c0_6, %c0_7], %7 {strides = array<i32>} : memref<32x512xf32, #tpu.memory_space<vmem>>, vector<32x512xf32>,
    %c0_i32_8 = arith.constant 0 : i32
    %9 = arith.cmpi eq, %arg2, %c0_i32_8 : i32
    %10 = arith.extui %9 : i1 to i32
    %c0_i32_9 = arith.constant 0 : i32
    %11 = arith.cmpi ne, %10, %c0_i32_9 : i32
    scf.if %11 {
      %c0_10 = arith.constant 0 : index
      %c0_11 = arith.constant 0 : index
      %12 = vector.load %arg6[%c0_10, %c0_11] : memref<32x512xf32, #tpu.memory_space<vmem>>, vector<32x512xf32>
      %c0_12 = arith.constant 0 : index
      %c0_13 = arith.constant 0 : index
      %13 = vector.load %arg5[%c0_12, %c0_13] : memref<32x512xf32, #tpu.memory_space<vmem>>, vector<32x512xf32>
      tpu.vector_store %arg5[%c0_12, %c0_13], %12 {strides = array<i32>} : memref<32x512xf32, #tpu.memory_space<vmem>>, vector<32x512xf32>,
    } else {
    }
    return
  }
  func.func @transform_0(%arg0: i32, %arg1: i32, %arg2: i32) -> (i32, i32) {
    %c0_i32 = arith.constant 0 : i32
    return %arg0, %arg2 : i32, i32
  }
  func.func @transform_1(%arg0: i32, %arg1: i32, %arg2: i32) -> (i32, i32) {
    %c0_i32 = arith.constant 0 : i32
    return %arg2, %arg1 : i32, i32
  }
  func.func @transform_2(%arg0: i32, %arg1: i32, %arg2: i32) -> (i32, i32) {
    %c0_i32 = arith.constant 0 : i32
    return %arg0, %arg1 : i32, i32
  }
}

</mosaic_0001>

<bundles_post_ra>
// kernel: tpu_custom_call.1
= control target key start
LH: loop header
LB: loop body
LE: loop exit
PB: predicated region body
PF: predicated region fallthrough
CT: control target
= control target key end

     0   :  { %7 = vsyncpa [#allocation4], 0  ;;  %s2120_s0 = inlined_call_operand.hbm [shape: f32[32,512], index: 0, kind: input, shape index: {}]   ;;  %s2121_s1 = inlined_call_operand.hbm [shape: f32[512,1024], index: 1, kind: input, shape index: {}]   ;;  %s2122_s2 = inlined_call_operand.hbm [shape: f32[32,1024], index: 2, kind: output, shape index: {}]  }
   0x1   :  { %8 = vsyncpa [#allocation7], 0 }
   0x2   :  { %10 = vsyncpa [#allocation7 + $0x1], 0 }
   0x3   :  { %11 = vsyncpa [#allocation5], 0 }
   0x4   :  { %13 = vsyncpa [#allocation5 + $0x1], 0  ;;  %s1617_s9 = smov 0   ;;  %s1619_s10 = smov 0  }
   0x5   :  { %s1621_s11 = smov 0   ;;  %s1623_s12 = smov 0  }
   0x6   :  { %s1625_s13 = smov 0   ;;  %s1627_s14 = smov 0  }
   0x7 LB: > { %s1077_s15 = sadd.s32 4294967295, %s1591_s14   ;;  %s1078_s16 = sadd.s32 4294967294, %s1591_s14   ;;  %s1591_s14 = sphi %s1627_s14, %s19_s14   ;;  %s1587_s13 = sphi %s1625_s13, %s2148_s13   ;;  %s1583_s12 = sphi %s1623_s12, %s2147_s12   ;;  %s1579_s11 = sphi %s1621_s11, %s2146_s11   ;;  %s1575_s10 = sphi %s1619_s10, %s2145_s10   ;;  %s1571_s9 = sphi %s1617_s9, %s2144_s9  }
   0x8   : > { %p82_p0 = scmp.ne.s32.totalorder %s1579_s11, %s1575_s10  ;;  %p83_p1 = scmp.eq.s32.totalorder %s1591_s14, 0 }
   0x9   : > { %p88_p2 = scmp.ne.s32.totalorder %s1575_s10, %s1571_s9  ;;  %p1654_p3 = scmp.eq.s32.totalorder %s1077_s15, 0 }
   0xa   : > { %p1658_p4 = por %p83_p1, %p82_p0  ;;  %p114_p5 = scmp.eq.s32.totalorder %s1077_s15, 1 }
   0xb   : > { %s2129_s17 = scalar_select %p1654_p3, 1, 0 }
   0xc   : > { %p1664_p6 = por %p1654_p3, %p88_p2  ;;  %p120_p7 = scmp.eq.s32.totalorder %s1078_s16, 1 }
   0xd   : > { %p1668_p8 = por %p114_p5, %p82_p0  ;;  %p1079_p9 = scmp.ge.s32.totalorder %s1591_s14, 1 }
   0xe   : > { %s2131_s19 = scalar_select %p1664_p6, 1, 0 }
   0xf   : > { %s2132_s20 = scalar_select %p1668_p8, 1, 0 }
  0x10   : > { %p1673_p10 = por %p120_p7, %p88_p2  ;;  %p127_p11 = scmp.lt.s32.totalorder %s1591_s14, 3 }
  0x11   : > { %s1593_s23 = smov [#allocation3]   ;;  %p1389_p1 = scmp.lt.s32.totalorder %s1591_s14, 2 }
  0x12   : > { %s2133_s21 = scalar_select %p1673_p10, 1, 0 }
  0x13   : > { %p1678_p12 = pnand %p1079_p9, %p127_p11  ;;  %s145_s24 = sshll.u32 %s1593_s23, 4  ;;  %s1682_s24 = int_to_ptr.vmem [resolvable:$true] %s145_s24 }
  0x14   : > { %p1696_p2 = pnand %p1389_p1, %p1658_p4  ;;  %s34_s27 = sadd.s32 1, %s1587_s13 }
  0x15   : > { %s2134_s22 = scalar_select %p1678_p12, 1, 0 }
  0x16   : > { %p1376_p13 = pneg %p1678_p12  ;;  %s1447_s30 = scalar_lea.hbm %s2120_s0, 2048 }
  0x17   : > { %s2136_s26 = scalar_select %p1696_p2, 1, 0 }
  0x18   : > { %p1690_p5 = pnand %p1376_p13, %p1654_p3  ;;  %p1448_p7 = scmp.ne.s32.totalorder %s2120_s0, %s1447_s30 }
  0x19   : > { %p1454_p4 = scmp.lt.u32.totalorder %s1447_s30, %s2120_s0 }
  0x1a   : > { %p1449_p9 = pneg %p1690_p5 }
  0x1c   : > { %p1450_p11 = pnand %p1449_p9, %p1448_p7 }
  0x1e   : > { %p1451_p13 = pneg %p1450_p11 }
  0x20   : > { %p1456_p1 = pnand %p1454_p4, %p1451_p13 }
  0x22   : > { %1459 = shalt.err (!%p1456_p1)
}
  0x23   : > { %s1460_s7 = scalar_lea.vmem %s1682_s24, 2048  ;;  %p1468_p6 = scmp.lt.s32.totalorder %s1682_s24, %s1682_s24 }
  0x24   : > { %p1461_p0 = scmp.ne.s32.totalorder %s1682_s24, %s1460_s7  ;;  %p1469_p3 = scmp.lt.s32.totalorder %s1460_s7, %s1460_s7 }
  0x26   : > { %p1463_p10 = pnand %p1461_p0, %p1449_p9  ;;  %p1470_p12 = por %p1469_p3, %p1468_p6 }
  0x28   : > { %p1464_p8 = pneg %p1463_p10 }
  0x2a   : > { %p1471_p2 = pnand %p1470_p12, %p1464_p8 }
  0x2c   : > { %1474 = shalt.err (!%p1471_p2)
}
  0x2d   : > { %s1594_s8 = smov 512   ;;  %s1595_s15 = smov 32  }
  0x2e   : > { %1379 = dma.hbm_to_vmem [thread:$0]  (!%p1690_p5), %s2120_s0, 2048, %s1682_s24, [#allocation4], %s1594_s8, %s1594_s8, %s1595_s15  }
  0x2f   : > { %p36_p3 = scmp.ge.s32.totalorder %s34_s27, 2  ;;  %s75_s23 = sadd.s32 1, %s1579_s11 }
  0x30   : > { %s159_s28 = sand.u32 1, %s1579_s11   ;;  %s1094_s3 = sshll.u32 %s1587_s13, 9 }
  0x31   : > { %s2150_s27 = smov (%p36_p3, %s34_s27), 0  ;;  %s1082_s29 = sshll.u32 %s159_s28, 11 }
  0x32   : > { %s71_s30 = ssub.s32 %s1587_s13, %s2150_s27  ;;  %s1735_s5 = scalar_lea.hbm %s2121_s1, %s1094_s3 }
  0x33   : > { %p73_p6 = scmp.eq.s32.totalorder %s71_s30, 0  ;;  %s163_s24 = scalar_lea.vmem [#allocation6], %s1082_s29 }
  0x34   : > { %s173_s6 = sshll.u32 %s163_s24, 4  ;;  %s1742_s16 = scalar_lea.sflag [#allocation7], %s159_s28  ;;  %s1740_s6 = int_to_ptr.vmem [resolvable:$true] %s173_s6 }
  0x35   : > { %s1738_s7 = scalar_select %p73_p6, %s1579_s11, %s75_s23  }
  0x36   : > { %s1475_s18 = scalar_lea.hbm %s1735_s5, 32768  ;;  %p2137_p10 = scmp.ne.s32.totalorder %s2136_s26, 0 }
  0x37   : > { %p1476_p8 = scmp.ne.s32.totalorder %s1735_s5, %s1475_s18  ;;  %s1480_s25 = scalar_lea.hbm %s2121_s1, 65536 }
  0x38   : > { %p1477_p12 = pneg %p2137_p10  ;;  %p1481_p2 = scmp.lt.u32.totalorder %s1735_s5, %s2121_s1 }
  0x39   : > { %p1482_p7 = scmp.lt.u32.totalorder %s1480_s25, %s1475_s18  ;;  %p1484_p11 = scmp.lt.u32.totalorder %s1475_s18, %s1735_s5 }
  0x3a   : > { %p1478_p0 = pnand %p1477_p12, %p1476_p8 }
  0x3b   : > { %p1483_p9 = por %p1482_p7, %p1481_p2 }
  0x3c   : > { %p1479_p5 = pneg %p1478_p0 }
  0x3d   : > { %p1485_p13 = por %p1484_p11, %p1483_p9 }
  0x3f   : > { %p1486_p4 = pnand %p1485_p13, %p1479_p5 }
  0x41   : > { %1489 = shalt.err (!%p1486_p4)
}
  0x42   : > { %s1490_s23 = scalar_lea.vmem %s1740_s6, 32768  ;;  %s1596_s28 = smov [#allocation6]  }
  0x43   : > { %p1491_p1 = scmp.ne.s32.totalorder %s1740_s6, %s1490_s23  ;;  %s1495_s24 = sshll.u32 %s1596_s28, 4  ;;  %s1496_s24 = int_to_ptr.vmem [resolvable:$false] %s1495_s24 }
  0x44   : > { %s1497_s30 = scalar_lea.vmem %s1496_s24, 65536  ;;  %p1498_p8 = scmp.lt.s32.totalorder %s1740_s6, %s1496_s24 }
  0x45   : > { %p1493_p3 = pnand %p1491_p1, %p1477_p12  ;;  %p1499_p0 = scmp.lt.s32.totalorder %s1497_s30, %s1490_s23 }
  0x47   : > { %p1494_p6 = pneg %p1493_p3  ;;  %p1500_p2 = por %p1499_p0, %p1498_p8 }
  0x49   : > { %p1501_p7 = pnand %p1500_p2, %p1494_p6 }
  0x4b   : > { %1504 = shalt.err (!%p1501_p7)
}
  0x4c   : > { %s1597_s18 = smov 1024   ;;  %p2138_p12 = scmp.ne.s32.totalorder %s2134_s22, 0 }
  0x4d   : > { %1383 = dma.hbm_to_vmem [thread:$0]  (!%p2137_p10), %s1735_s5, 32768, %s1740_s6, %s1742_s16, %s1597_s18, %s1594_s8, %s1595_s15  }
  0x4e   : > { %185 = sbr.rel (%p2138_p12) target bundleno = 464 (0x1d0), region = 28  ;;  %p2139_p5 = scmp.ne.s32.totalorder (!%p2138_p12), %s2129_s17, 0 }
  0x55   : > { %1558 = dma.done.wait (%p2139_p5), [#allocation4], 2048  }
  0x56   : > { %1560 = vsyncadd (%p2139_p5), [#allocation4], 4294965248  ;;  %s1779_s3 = sand.u32 1, %s1575_s10   ;;  %p2140_p10 = scmp.ne.s32.totalorder %s2131_s19, 0 }
  0x57   : > { %s1087_s26 = sshll.u32 %s1779_s3, 11  ;;  %s192_s25 = scalar_lea.sflag [#allocation7], %s1779_s3 }
  0x58   : > { %s1783_s29 = scalar_lea.vmem [#allocation6], %s1087_s26 }
  0x59   : > { %1562 = dma.done.wait (%p2140_p10), %s192_s25, 32768  }
  0x5a   : > { %1564 = vsyncadd (%p2140_p10), %s192_s25, 4294934528  ;;  %v275_v0 = vld [vmem:[%s1783_s29 + $0x8] sm:$0xff]  ;;  %v277_v2 = vld [vmem:[%s1783_s29 + $0x18] sm:$0xff]  ;;  %s1088_s17 = sshll.u32 %s1779_s3, 7  ;;  %s1095_s22 = sshll.u32 %s1583_s12, 9 }
  0x5b   : > { %v279_v1 = vld [vmem:[%s1783_s29 + $0x28] sm:$0xff]  ;;  %v281_v4 = vld [vmem:[%s1783_s29 + $0x38] sm:$0xff]  ;;  %v274_v5 = vld [vmem:[%s1783_s29] sm:$0xff]  ;;  %s2046_s19 = scalar_lea.vmem [#allocation8], %s1088_s17  ;;  %s2065_s6 = scalar_lea.hbm %s2122_s2, %s1095_s22 }
  0x5c   : > { %v1096_v3 = vpack.c.bf16 %v279_v1, %v275_v0  ;;  %v278_v6 = vld [vmem:[%s1783_s29 + $0x20] sm:$0xff]  ;;  %v1224_v7 = vpack.c.bf16 %v281_v4, %v277_v2  ;;  %v276_v9 = vld [vmem:[%s1783_s29 + $0x10] sm:$0xff]  ;;  %v283_v11 = vld [vmem:[%s1783_s29 + $0x48] sm:$0xff]  ;;  %s970_s8 = sshll.u32 %s2046_s19, 4  ;;  %s954_s12 = scalar_lea.sflag [#allocation5], %s1779_s3  ;;  %s2067_s8 = int_to_ptr.vmem [resolvable:$true] %s970_s8 }
  0x5d   : > { %v1098_v8 = vpack.c.bf16 %v278_v6, %v274_v5  ;;  %v280_v10 = vld [vmem:[%s1783_s29 + $0x30] sm:$0xff]  ;;  %v287_v13 = vld [vmem:[%s1783_s29 + $0x68] sm:$0xff]  ;;  %v285_v14 = vld [vmem:[%s1783_s29 + $0x58] sm:$0xff]  ;;  %s1505_s16 = scalar_lea.vmem %s2067_s8, 2048  ;;  %p2141_p11 = scmp.ne.s32.totalorder %s2132_s20, 0 }
  0x5e   : > { %1097 = vmatprep.subr.bf16.mxu0 %v1096_v3  ;;  %v1226_v12 = vpack.c.bf16 %v280_v10, %v276_v9  ;;  %v289_v15 = vld [vmem:[%s1783_s29 + $0x78] sm:$0xff]  ;;  %1225 = vmatprep.subr.bf16.mxu1 %v1224_v7  ;;  %v1100_v16 = vpack.c.bf16 %v287_v13, %v283_v11  ;;  %v282_v18 = vld [vmem:[%s1783_s29 + $0x40] sm:$0xff]  ;;  %v284_v20 = vld [vmem:[%s1783_s29 + $0x50] sm:$0xff]  ;;  %p1506_p9 = scmp.ne.s32.totalorder %s2067_s8, %s1505_s16  ;;  %s1598_s4 = smov [#allocation8]  }
  0x5f   : > { %1099 = vmatpush1.bf16.msra.mxu0 %v1098_v8  ;;  %v1228_v17 = vpack.c.bf16 %v289_v15, %v285_v14  ;;  %v286_v19 = vld [vmem:[%s1783_s29 + $0x60] sm:$0xff]  ;;  %v288_v22 = vld [vmem:[%s1783_s29 + $0x70] sm:$0xff]  ;;  %v291_v23 = vld [vmem:[%s1783_s29 + $0x88] sm:$0xff]  ;;  %s1509_s23 = sshll.u32 %s1598_s4, 4  ;;  %s1510_s23 = int_to_ptr.vmem [resolvable:$false] %s1509_s23 }
  0x60   : > { %1227 = vmatpush1.bf16.msra.mxu1 %v1226_v12  ;;  %v1102_v21 = vpack.c.bf16 %v286_v19, %v282_v18  ;;  %v295_v24 = vld [vmem:[%s1783_s29 + $0xa8] sm:$0xff]  ;;  %1101 = vmatprep.subr.bf16.mxu0 %v1100_v16  ;;  %v1230_v25 = vpack.c.bf16 %v288_v22, %v284_v20  ;;  %v293_v27 = vld [vmem:[%s1783_s29 + $0x98] sm:$0xff]  ;;  %v290_v29 = vld [vmem:[%s1783_s29 + $0x80] sm:$0xff]  ;;  %p1507_p13 = pnand %p1506_p9, %p2141_p11  ;;  %s1511_s28 = scalar_lea.vmem %s1510_s23, 4096 }
  0x61   : > { %1229 = vmatprep.subr.bf16.mxu1 %v1228_v17  ;;  %v1104_v26 = vpack.c.bf16 %v295_v24, %v291_v23  ;;  %v297_v28 = vld [vmem:[%s1783_s29 + $0xb8] sm:$0xff]  ;;  %v294_v31 = vld [vmem:[%s1783_s29 + $0xa0] sm:$0xff]  ;;  %v292_v32 = vld [vmem:[%s1783_s29 + $0x90] sm:$0xff]  ;;  %p1512_p1 = scmp.lt.s32.totalorder %s2067_s8, %s1510_s23  ;;  %p1513_p3 = scmp.lt.s32.totalorder %s1511_s28, %s1505_s16 }
  0x62   : > { %v1232_v30 = vpack.c.bf16 %v297_v28, %v293_v27  ;;  %v296_v33 = vld [vmem:[%s1783_s29 + $0xb0] sm:$0xff]  ;;  %v1106_v34 = vpack.c.bf16 %v294_v31, %v290_v29  ;;  %v299_v35 = vld [vmem:[%s1783_s29 + $0xc8] sm:$0xff]  ;;  %v301_v37 = vld [vmem:[%s1783_s29 + $0xd8] sm:$0xff]  ;;  %p1508_p4 = pneg %p1507_p13 }
  0x63   : > { %1103 = vmatpush1.bf16.msra.mxu0 %v1102_v21  ;;  %v303_v36 = vld [vmem:[%s1783_s29 + $0xe8] sm:$0xff]  ;;  %v1234_v38 = vpack.c.bf16 %v296_v33, %v292_v32  ;;  %v305_v40 = vld [vmem:[%s1783_s29 + $0xf8] sm:$0xff]  ;;  %v298_v41 = vld [vmem:[%s1783_s29 + $0xc0] sm:$0xff]  ;;  %p1514_p6 = por %p1513_p3, %p1512_p1 }
  0x64   : > { %1231 = vmatpush1.bf16.msra.mxu1 %v1230_v25  ;;  %1105 = vmatprep.subr.bf16.mxu0 %v1104_v26  ;;  %v1108_v39 = vpack.c.bf16 %v303_v36, %v299_v35  ;;  %v302_v42 = vld [vmem:[%s1783_s29 + $0xe0] sm:$0xff]  ;;  %v1236_v43 = vpack.c.bf16 %v305_v40, %v301_v37  ;;  %v300_v44 = vld [vmem:[%s1783_s29 + $0xd0] sm:$0xff]  ;;  %v307_v46 = vld [vmem:[%s1783_s29 + $0x108] sm:$0xff] }
  0x65   : > { %1233 = vmatprep.subr.bf16.mxu1 %v1232_v30  ;;  %v304_v45 = vld [vmem:[%s1783_s29 + $0xf0] sm:$0xff]  ;;  %v311_v47 = vld [vmem:[%s1783_s29 + $0x128] sm:$0xff]  ;;  %v309_v48 = vld [vmem:[%s1783_s29 + $0x118] sm:$0xff]  ;;  %v1110_v50 = vpack.c.bf16 %v302_v42, %v298_v41  ;;  %p1515_p8 = pnand %p1514_p6, %p1508_p4 }
  0x66   : > { %v313_v49 = vld [vmem:[%s1783_s29 + $0x138] sm:$0xff]  ;;  %v1238_v51 = vpack.c.bf16 %v304_v45, %v300_v44  ;;  %v1112_v52 = vpack.c.bf16 %v311_v47, %v307_v46  ;;  %v306_v53 = vld [vmem:[%s1783_s29 + $0x100] sm:$0xff]  ;;  %v308_v55 = vld [vmem:[%s1783_s29 + $0x110] sm:$0xff] }
  0x67   : > { %1107 = vmatpush1.bf16.msra.mxu0 %v1106_v34  ;;  %v310_v54 = vld [vmem:[%s1783_s29 + $0x120] sm:$0xff]  ;;  %v1240_v56 = vpack.c.bf16 %v313_v49, %v309_v48  ;;  %v312_v57 = vld [vmem:[%s1783_s29 + $0x130] sm:$0xff]  ;;  %v315_v58 = vld [vmem:[%s1783_s29 + $0x148] sm:$0xff] }
  0x68   : > { %1235 = vmatpush1.bf16.msra.mxu1 %v1234_v38  ;;  %1109 = vmatprep.subr.bf16.mxu0 %v1108_v39  ;;  %v319_v59 = vld [vmem:[%s1783_s29 + $0x168] sm:$0xff]  ;;  %v317_v60 = vld [vmem:[%s1783_s29 + $0x158] sm:$0xff]  ;;  %v1114_v62 = vpack.c.bf16 %v310_v54, %v306_v53  ;;  %v1242_v63 = vpack.c.bf16 %v312_v57, %v308_v55  ;;  %v314_v1 = vld [vmem:[%s1783_s29 + $0x140] sm:$0xff] }
  0x69   : > { %1237 = vmatprep.subr.bf16.mxu1 %v1236_v43  ;;  %v321_v61 = vld [vmem:[%s1783_s29 + $0x178] sm:$0xff]  ;;  %v1116_v0 = vpack.c.bf16 %v319_v59, %v315_v58  ;;  %v318_v2 = vld [vmem:[%s1783_s29 + $0x160] sm:$0xff]  ;;  %v316_v3 = vld [vmem:[%s1783_s29 + $0x150] sm:$0xff] }
  0x6a   : > { %v1244_v4 = vpack.c.bf16 %v321_v61, %v317_v60  ;;  %v320_v5 = vld [vmem:[%s1783_s29 + $0x170] sm:$0xff]  ;;  %v323_v6 = vld [vmem:[%s1783_s29 + $0x188] sm:$0xff]  ;;  %v325_v8 = vld [vmem:[%s1783_s29 + $0x198] sm:$0xff]  ;;  %v1118_v10 = vpack.c.bf16 %v318_v2, %v314_v1 }
  0x6b   : > { %1111 = vmatpush1.bf16.msra.mxu0 %v1110_v50  ;;  %v327_v7 = vld [vmem:[%s1783_s29 + $0x1a8] sm:$0xff]  ;;  %v329_v9 = vld [vmem:[%s1783_s29 + $0x1b8] sm:$0xff]  ;;  %v1246_v11 = vpack.c.bf16 %v320_v5, %v316_v3  ;;  %v322_v13 = vld [vmem:[%s1783_s29 + $0x180] sm:$0xff] }
  0x6c   : > { %1239 = vmatpush1.bf16.msra.mxu1 %v1238_v51  ;;  %1113 = vmatprep.subr.bf16.mxu0 %v1112_v52  ;;  %v1120_v12 = vpack.c.bf16 %v327_v7, %v323_v6  ;;  %v326_v14 = vld [vmem:[%s1783_s29 + $0x1a0] sm:$0xff]  ;;  %v324_v15 = vld [vmem:[%s1783_s29 + $0x190] sm:$0xff]  ;;  %v1248_v16 = vpack.c.bf16 %v329_v9, %v325_v8  ;;  %v331_v18 = vld [vmem:[%s1783_s29 + $0x1c8] sm:$0xff] }
  0x6d   : > { %1241 = vmatprep.subr.bf16.mxu1 %v1240_v56  ;;  %v328_v17 = vld [vmem:[%s1783_s29 + $0x1b0] sm:$0xff]  ;;  %v335_v19 = vld [vmem:[%s1783_s29 + $0x1e8] sm:$0xff]  ;;  %v333_v20 = vld [vmem:[%s1783_s29 + $0x1d8] sm:$0xff]  ;;  %v1122_v22 = vpack.c.bf16 %v326_v14, %v322_v13 }
  0x6e   : > { %v337_v21 = vld [vmem:[%s1783_s29 + $0x1f8] sm:$0xff]  ;;  %v1250_v23 = vpack.c.bf16 %v328_v17, %v324_v15  ;;  %v1124_v24 = vpack.c.bf16 %v335_v19, %v331_v18  ;;  %v330_v25 = vld [vmem:[%s1783_s29 + $0x1c0] sm:$0xff]  ;;  %v332_v27 = vld [vmem:[%s1783_s29 + $0x1d0] sm:$0xff] }
  0x6f   : > { %1115 = vmatpush1.bf16.msra.mxu0 %v1114_v62  ;;  %v334_v26 = vld [vmem:[%s1783_s29 + $0x1e0] sm:$0xff]  ;;  %v1252_v28 = vpack.c.bf16 %v337_v21, %v333_v20  ;;  %v336_v29 = vld [vmem:[%s1783_s29 + $0x1f0] sm:$0xff]  ;;  %v339_v30 = vld [vmem:[%s1783_s29 + $0x208] sm:$0xff] }
  0x70   : > { %1243 = vmatpush1.bf16.msra.mxu1 %v1242_v63  ;;  %1117 = vmatprep.subr.bf16.mxu0 %v1116_v0  ;;  %v343_v31 = vld [vmem:[%s1783_s29 + $0x228] sm:$0xff]  ;;  %v341_v32 = vld [vmem:[%s1783_s29 + $0x218] sm:$0xff]  ;;  %v1126_v34 = vpack.c.bf16 %v334_v26, %v330_v25  ;;  %v1254_v35 = vpack.c.bf16 %v336_v29, %v332_v27  ;;  %v338_v37 = vld [vmem:[%s1783_s29 + $0x200] sm:$0xff] }
  0x71   : > { %1245 = vmatprep.subr.bf16.mxu1 %v1244_v4  ;;  %v345_v33 = vld [vmem:[%s1783_s29 + $0x238] sm:$0xff]  ;;  %v1128_v36 = vpack.c.bf16 %v343_v31, %v339_v30  ;;  %v342_v38 = vld [vmem:[%s1783_s29 + $0x220] sm:$0xff]  ;;  %v340_v39 = vld [vmem:[%s1783_s29 + $0x210] sm:$0xff] }
  0x72   : > { %v1256_v40 = vpack.c.bf16 %v345_v33, %v341_v32  ;;  %v344_v41 = vld [vmem:[%s1783_s29 + $0x230] sm:$0xff]  ;;  %v347_v42 = vld [vmem:[%s1783_s29 + $0x248] sm:$0xff]  ;;  %v349_v44 = vld [vmem:[%s1783_s29 + $0x258] sm:$0xff]  ;;  %v1130_v46 = vpack.c.bf16 %v342_v38, %v338_v37 }
  0x73   : > { %1119 = vmatpush1.bf16.msra.mxu0 %v1118_v10  ;;  %v351_v43 = vld [vmem:[%s1783_s29 + $0x268] sm:$0xff]  ;;  %v353_v45 = vld [vmem:[%s1783_s29 + $0x278] sm:$0xff]  ;;  %v1258_v47 = vpack.c.bf16 %v344_v41, %v340_v39  ;;  %v346_v49 = vld [vmem:[%s1783_s29 + $0x240] sm:$0xff] }
  0x74   : > { %1247 = vmatpush1.bf16.msra.mxu1 %v1246_v11  ;;  %1121 = vmatprep.subr.bf16.mxu0 %v1120_v12  ;;  %v1132_v48 = vpack.c.bf16 %v351_v43, %v347_v42  ;;  %v350_v50 = vld [vmem:[%s1783_s29 + $0x260] sm:$0xff]  ;;  %v348_v51 = vld [vmem:[%s1783_s29 + $0x250] sm:$0xff]  ;;  %v1260_v52 = vpack.c.bf16 %v353_v45, %v349_v44  ;;  %v355_v54 = vld [vmem:[%s1783_s29 + $0x288] sm:$0xff] }
  0x75   : > { %1249 = vmatprep.subr.bf16.mxu1 %v1248_v16  ;;  %v352_v53 = vld [vmem:[%s1783_s29 + $0x270] sm:$0xff]  ;;  %v359_v55 = vld [vmem:[%s1783_s29 + $0x2a8] sm:$0xff]  ;;  %v357_v56 = vld [vmem:[%s1783_s29 + $0x298] sm:$0xff]  ;;  %v1134_v58 = vpack.c.bf16 %v350_v50, %v346_v49 }
  0x76   : > { %v361_v57 = vld [vmem:[%s1783_s29 + $0x2b8] sm:$0xff]  ;;  %v1262_v59 = vpack.c.bf16 %v352_v53, %v348_v51  ;;  %v1136_v60 = vpack.c.bf16 %v359_v55, %v355_v54  ;;  %v354_v61 = vld [vmem:[%s1783_s29 + $0x280] sm:$0xff]  ;;  %v356_v63 = vld [vmem:[%s1783_s29 + $0x290] sm:$0xff] }
  0x77   : > { %1123 = vmatpush1.bf16.msra.mxu0 %v1122_v22  ;;  %v358_v62 = vld [vmem:[%s1783_s29 + $0x2a0] sm:$0xff]  ;;  %v1264_v0 = vpack.c.bf16 %v361_v57, %v357_v56  ;;  %v360_v1 = vld [vmem:[%s1783_s29 + $0x2b0] sm:$0xff]  ;;  %v363_v2 = vld [vmem:[%s1783_s29 + $0x2c8] sm:$0xff] }
  0x78   : > { %1251 = vmatpush1.bf16.msra.mxu1 %v1250_v23  ;;  %1125 = vmatprep.subr.bf16.mxu0 %v1124_v24  ;;  %v367_v3 = vld [vmem:[%s1783_s29 + $0x2e8] sm:$0xff]  ;;  %v365_v4 = vld [vmem:[%s1783_s29 + $0x2d8] sm:$0xff]  ;;  %v1138_v6 = vpack.c.bf16 %v358_v62, %v354_v61  ;;  %v362_v7 = vld [vmem:[%s1783_s29 + $0x2c0] sm:$0xff]  ;;  %v1266_v8 = vpack.c.bf16 %v360_v1, %v356_v63 }
  0x79   : > { %1253 = vmatprep.subr.bf16.mxu1 %v1252_v28  ;;  %v369_v5 = vld [vmem:[%s1783_s29 + $0x2f8] sm:$0xff]  ;;  %v1140_v9 = vpack.c.bf16 %v367_v3, %v363_v2  ;;  %v366_v10 = vld [vmem:[%s1783_s29 + $0x2e0] sm:$0xff]  ;;  %v364_v11 = vld [vmem:[%s1783_s29 + $0x2d0] sm:$0xff] }
  0x7a   : > { %v368_v12 = vld [vmem:[%s1783_s29 + $0x2f0] sm:$0xff]  ;;  %v1268_v13 = vpack.c.bf16 %v369_v5, %v365_v4  ;;  %v371_v14 = vld [vmem:[%s1783_s29 + $0x308] sm:$0xff]  ;;  %v373_v17 = vld [vmem:[%s1783_s29 + $0x318] sm:$0xff]  ;;  %v1142_v19 = vpack.c.bf16 %v366_v10, %v362_v7 }
  0x7b   : > { %1127 = vmatpush1.bf16.msra.mxu0 %v1126_v34  ;;  %v375_v15 = vld [vmem:[%s1783_s29 + $0x328] sm:$0xff]  ;;  %v377_v18 = vld [vmem:[%s1783_s29 + $0x338] sm:$0xff]  ;;  %v1270_v20 = vpack.c.bf16 %v368_v12, %v364_v11  ;;  %v370_v22 = vld [vmem:[%s1783_s29 + $0x300] sm:$0xff] }
  0x7c   : > { %1255 = vmatpush1.bf16.msra.mxu1 %v1254_v35  ;;  %1129 = vmatprep.subr.bf16.mxu0 %v1128_v36  ;;  %v259_v16 = vld [vmem:[#allocation3 + $0x8] sm:$0xff]  ;;  %v1144_v21 = vpack.c.bf16 %v375_v15, %v371_v14  ;;  %v374_v23 = vld [vmem:[%s1783_s29 + $0x320] sm:$0xff]  ;;  %v372_v24 = vld [vmem:[%s1783_s29 + $0x310] sm:$0xff]  ;;  %v1272_v25 = vpack.c.bf16 %v377_v18, %v373_v17 }
  0x7d   : > { %1257 = vmatprep.subr.bf16.mxu1 %v1256_v40  ;;  %594 = vmatprep.mubr.f32.mxu0 %v259_v16  ;;  %v376_v26 = vld [vmem:[%s1783_s29 + $0x330] sm:$0xff]  ;;  %v379_v27 = vld [vmem:[%s1783_s29 + $0x348] sm:$0xff]  ;;  %v381_v29 = vld [vmem:[%s1783_s29 + $0x358] sm:$0xff]  ;;  %v1146_v31 = vpack.c.bf16 %v374_v23, %v370_v22 }
  0x7e   : > { %772 = vmatprep.mubr.f32.mxu1 %v259_v16  ;;  %v383_v28 = vld [vmem:[%s1783_s29 + $0x368] sm:$0xff]  ;;  %v385_v30 = vld [vmem:[%s1783_s29 + $0x378] sm:$0xff]  ;;  %v1274_v32 = vpack.c.bf16 %v376_v26, %v372_v24  ;;  %v378_v34 = vld [vmem:[%s1783_s29 + $0x340] sm:$0xff] }
  0x7f   : > { %1131 = vmatpush1.bf16.msra.mxu0 %v1130_v46  ;;  %v1148_v33 = vpack.c.bf16 %v383_v28, %v379_v27  ;;  %v382_v35 = vld [vmem:[%s1783_s29 + $0x360] sm:$0xff]  ;;  %v380_v36 = vld [vmem:[%s1783_s29 + $0x350] sm:$0xff]  ;;  %v1276_v37 = vpack.c.bf16 %v385_v30, %v381_v29  ;;  %v387_v39 = vld [vmem:[%s1783_s29 + $0x388] sm:$0xff] }
  0x80   : > { %1259 = vmatpush1.bf16.msra.mxu1 %v1258_v47  ;;  %1133 = vmatprep.subr.bf16.mxu0 %v1132_v48  ;;  %v384_v38 = vld [vmem:[%s1783_s29 + $0x370] sm:$0xff]  ;;  %v391_v40 = vld [vmem:[%s1783_s29 + $0x3a8] sm:$0xff]  ;;  %v389_v41 = vld [vmem:[%s1783_s29 + $0x398] sm:$0xff]  ;;  %v1150_v43 = vpack.c.bf16 %v382_v35, %v378_v34 }
  0x81   : > { %1261 = vmatprep.subr.bf16.mxu1 %v1260_v52  ;;  %v393_v42 = vld [vmem:[%s1783_s29 + $0x3b8] sm:$0xff]  ;;  %v1278_v44 = vpack.c.bf16 %v384_v38, %v380_v36  ;;  %v1152_v45 = vpack.c.bf16 %v391_v40, %v387_v39  ;;  %v386_v46 = vld [vmem:[%s1783_s29 + $0x380] sm:$0xff]  ;;  %v388_v48 = vld [vmem:[%s1783_s29 + $0x390] sm:$0xff] }
  0x82   : > { %v390_v47 = vld [vmem:[%s1783_s29 + $0x3a0] sm:$0xff]  ;;  %v1280_v49 = vpack.c.bf16 %v393_v42, %v389_v41  ;;  %v392_v50 = vld [vmem:[%s1783_s29 + $0x3b0] sm:$0xff]  ;;  %v395_v51 = vld [vmem:[%s1783_s29 + $0x3c8] sm:$0xff] }
  0x83   : > { %1135 = vmatpush1.bf16.msra.mxu0 %v1134_v58  ;;  %v399_v52 = vld [vmem:[%s1783_s29 + $0x3e8] sm:$0xff]  ;;  %v397_v53 = vld [vmem:[%s1783_s29 + $0x3d8] sm:$0xff]  ;;  %v1154_v55 = vpack.c.bf16 %v390_v47, %v386_v46  ;;  %v1282_v56 = vpack.c.bf16 %v392_v50, %v388_v48  ;;  %v394_v58 = vld [vmem:[%s1783_s29 + $0x3c0] sm:$0xff] }
  0x84   : > { %1263 = vmatpush1.bf16.msra.mxu1 %v1262_v59  ;;  %1137 = vmatprep.subr.bf16.mxu0 %v1136_v60  ;;  %v401_v54 = vld [vmem:[%s1783_s29 + $0x3f8] sm:$0xff]  ;;  %v1156_v57 = vpack.c.bf16 %v399_v52, %v395_v51  ;;  %v398_v59 = vld [vmem:[%s1783_s29 + $0x3e0] sm:$0xff]  ;;  %v396_v60 = vld [vmem:[%s1783_s29 + $0x3d0] sm:$0xff] }
  0x85   : > { %1265 = vmatprep.subr.bf16.mxu1 %v1264_v0  ;;  %v1284_v61 = vpack.c.bf16 %v401_v54, %v397_v53  ;;  %v400_v62 = vld [vmem:[%s1783_s29 + $0x3f0] sm:$0xff]  ;;  %v403_v63 = vld [vmem:[%s1783_s29 + $0x408] sm:$0xff]  ;;  %v405_v1 = vld [vmem:[%s1783_s29 + $0x418] sm:$0xff]  ;;  %v1158_v3 = vpack.c.bf16 %v398_v59, %v394_v58 }
  0x86   : > { %v407_v0 = vld [vmem:[%s1783_s29 + $0x428] sm:$0xff]  ;;  %v409_v2 = vld [vmem:[%s1783_s29 + $0x438] sm:$0xff]  ;;  %v1286_v4 = vpack.c.bf16 %v400_v62, %v396_v60  ;;  %v406_v7 = vld [vmem:[%s1783_s29 + $0x420] sm:$0xff] }
  0x87   : > { %1139 = vmatpush1.bf16.msra.mxu0 %v1138_v6  ;;  %v1160_v5 = vpack.c.bf16 %v407_v0, %v403_v63  ;;  %v402_v6 = vld [vmem:[%s1783_s29 + $0x400] sm:$0xff]  ;;  %v408_v10 = vld [vmem:[%s1783_s29 + $0x430] sm:$0xff]  ;;  %v411_v11 = vld [vmem:[%s1783_s29 + $0x448] sm:$0xff] }
  0x88   : > { %1267 = vmatpush1.bf16.msra.mxu1 %v1266_v8  ;;  %1141 = vmatprep.subr.bf16.mxu0 %v1140_v9  ;;  %v404_v8 = vld [vmem:[%s1783_s29 + $0x410] sm:$0xff]  ;;  %v1288_v9 = vpack.c.bf16 %v409_v2, %v405_v1  ;;  %v415_v12 = vld [vmem:[%s1783_s29 + $0x468] sm:$0xff]  ;;  %v417_v14 = vld [vmem:[%s1783_s29 + $0x478] sm:$0xff]  ;;  %v1162_v16 = vpack.c.bf16 %v406_v7, %v402_v6 }
  0x89   : > { %1269 = vmatprep.subr.bf16.mxu1 %v1268_v13  ;;  %v413_v13 = vld [vmem:[%s1783_s29 + $0x458] sm:$0xff]  ;;  %v258_v15 = vld [vmem:[#allocation3] sm:$0xff]  ;;  %v1290_v17 = vpack.c.bf16 %v408_v10, %v404_v8  ;;  %v1164_v18 = vpack.c.bf16 %v415_v12, %v411_v11  ;;  %v416_v23 = vld [vmem:[%s1783_s29 + $0x470] sm:$0xff] }
  0x8a   : > { %v1292_v22 = vpack.c.bf16 %v417_v14, %v413_v13  ;;  %v419_v24 = vld [vmem:[%s1783_s29 + $0x488] sm:$0xff]  ;;  %v421_v26 = vld [vmem:[%s1783_s29 + $0x498] sm:$0xff]  ;;  %v424_v35 = vld [vmem:[%s1783_s29 + $0x4b0] sm:$0xff] }
  0x8b   : > { %1143 = vmatpush1.bf16.msra.mxu0 %v1142_v19  ;;  %v410_v19 = vld [vmem:[%s1783_s29 + $0x440] sm:$0xff]  ;;  %v425_v27 = vld [vmem:[%s1783_s29 + $0x4b8] sm:$0xff]  ;;  %v427_v36 = vld [vmem:[%s1783_s29 + $0x4c8] sm:$0xff] }
  0x8c   : > { %1271 = vmatpush1.bf16.msra.mxu1 %v1270_v20  ;;  %1145 = vmatprep.subr.bf16.mxu0 %v1144_v21  ;;  %v414_v20 = vld [vmem:[%s1783_s29 + $0x460] sm:$0xff]  ;;  %v412_v21 = vld [vmem:[%s1783_s29 + $0x450] sm:$0xff]  ;;  %v1296_v34 = vpack.c.bf16 %v425_v27, %v421_v26  ;;  %v429_v38 = vld [vmem:[%s1783_s29 + $0x4d8] sm:$0xff] }
  0x8d   : > { %1273 = vmatprep.subr.bf16.mxu1 %v1272_v25  ;;  %v423_v25 = vld [vmem:[%s1783_s29 + $0x4a8] sm:$0xff]  ;;  %v1166_v28 = vpack.c.bf16 %v414_v20, %v410_v19  ;;  %v1294_v29 = vpack.c.bf16 %v416_v23, %v412_v21  ;;  %v433_v39 = vld [vmem:[%s1783_s29 + $0x4f8] sm:$0xff]  ;;  %v432_v47 = vld [vmem:[%s1783_s29 + $0x4f0] sm:$0xff] }
  0x8e   : > { %v1168_v30 = vpack.c.bf16 %v423_v25, %v419_v24  ;;  %v1300_v46 = vpack.c.bf16 %v433_v39, %v429_v38  ;;  %v435_v48 = vld [vmem:[%s1783_s29 + $0x508] sm:$0xff]  ;;  %v437_v50 = vld [vmem:[%s1783_s29 + $0x518] sm:$0xff]  ;;  %v434_v53 = vld [vmem:[%s1783_s29 + $0x500] sm:$0xff] }
  0x8f   : > { %1147 = vmatpush1.bf16.msra.mxu0 %v1146_v31  ;;  %v418_v31 = vld [vmem:[%s1783_s29 + $0x480] sm:$0xff]  ;;  %v441_v51 = vld [vmem:[%s1783_s29 + $0x538] sm:$0xff]  ;;  %v440_v58 = vld [vmem:[%s1783_s29 + $0x530] sm:$0xff] }
  0x90   : > { %1275 = vmatpush1.bf16.msra.mxu1 %v1274_v32  ;;  %1149 = vmatprep.subr.bf16.mxu0 %v1148_v33  ;;  %v422_v32 = vld [vmem:[%s1783_s29 + $0x4a0] sm:$0xff]  ;;  %v420_v33 = vld [vmem:[%s1783_s29 + $0x490] sm:$0xff]  ;;  %v443_v59 = vld [vmem:[%s1783_s29 + $0x548] sm:$0xff]  ;;  %v1304_v60 = vpack.c.bf16 %v441_v51, %v437_v50 }
  0x91   : > { %1277 = vmatprep.subr.bf16.mxu1 %v1276_v37  ;;  %v431_v37 = vld [vmem:[%s1783_s29 + $0x4e8] sm:$0xff]  ;;  %v1170_v40 = vpack.c.bf16 %v422_v32, %v418_v31  ;;  %v1298_v41 = vpack.c.bf16 %v424_v35, %v420_v33  ;;  %v438_v54 = vld [vmem:[%s1783_s29 + $0x520] sm:$0xff]  ;;  %v445_v0 = vld [vmem:[%s1783_s29 + $0x558] sm:$0xff] }
  0x92   : > { %v1172_v42 = vpack.c.bf16 %v431_v37, %v427_v36  ;;  %v263_v62 = vld [vmem:[#allocation3 + $0x28] sm:$0xff]  ;;  %v262_v63 = vld [vmem:[#allocation3 + $0x20] sm:$0xff]  ;;  %v449_v1 = vld [vmem:[%s1783_s29 + $0x578] sm:$0xff]  ;;  %v1178_v2 = vpack.c.bf16 %v438_v54, %v434_v53 }
  0x93   : > { %1151 = vmatpush1.bf16.msra.mxu0 %v1150_v43  ;;  %v426_v43 = vld [vmem:[%s1783_s29 + $0x4c0] sm:$0xff]  ;;  %v444_v7 = vld [vmem:[%s1783_s29 + $0x550] sm:$0xff]  ;;  %v267_v8 = vld [vmem:[#allocation3 + $0x48] sm:$0xff]  ;;  %v1308_v10 = vpack.c.bf16 %v449_v1, %v445_v0 }
  0x94   : > { %1279 = vmatpush1.bf16.msra.mxu1 %v1278_v44  ;;  %1153 = vmatprep.subr.bf16.mxu0 %v1152_v45  ;;  %v430_v44 = vld [vmem:[%s1783_s29 + $0x4e0] sm:$0xff]  ;;  %v428_v45 = vld [vmem:[%s1783_s29 + $0x4d0] sm:$0xff]  ;;  %v451_v12 = vld [vmem:[%s1783_s29 + $0x588] sm:$0xff] }
  0x95   : > { %1281 = vmatprep.subr.bf16.mxu1 %v1280_v49  ;;  %v439_v49 = vld [vmem:[%s1783_s29 + $0x528] sm:$0xff]  ;;  %v1174_v52 = vpack.c.bf16 %v430_v44, %v426_v43  ;;  %v448_v11 = vld [vmem:[%s1783_s29 + $0x570] sm:$0xff]  ;;  %v453_v14 = vld [vmem:[%s1783_s29 + $0x598] sm:$0xff] }
  0x96   : > { %v455_v13 = vld [vmem:[%s1783_s29 + $0x5a8] sm:$0xff]  ;;  %v1310_v19 = vpack.c.bf16 %v448_v11, %v444_v7  ;;  %v454_v21 = vld [vmem:[%s1783_s29 + $0x5a0] sm:$0xff]  ;;  %v456_v25 = vld [vmem:[%s1783_s29 + $0x5b0] sm:$0xff] }
  0x97   : > { %1155 = vmatpush1.bf16.msra.mxu0 %v1154_v55  ;;  %v1302_v55 = vpack.c.bf16 %v432_v47, %v428_v45  ;;  %v1184_v20 = vpack.c.bf16 %v455_v13, %v451_v12  ;;  %v270_v23 = vld [vmem:[#allocation3 + $0x60] sm:$0xff]  ;;  %v459_v26 = vld [vmem:[%s1783_s29 + $0x5c8] sm:$0xff]  ;;  %v261_v31 = vld [vmem:[#allocation3 + $0x18] sm:$0xff] }
  0x98   : > { %1283 = vmatpush1.bf16.msra.mxu1 %v1282_v56  ;;  %1157 = vmatprep.subr.bf16.mxu0 %v1156_v57  ;;  %v1176_v56 = vpack.c.bf16 %v439_v49, %v435_v48  ;;  %v436_v57 = vld [vmem:[%s1783_s29 + $0x510] sm:$0xff]  ;;  %v463_v27 = vld [vmem:[%s1783_s29 + $0x5e8] sm:$0xff]  ;;  %v462_v35 = vld [vmem:[%s1783_s29 + $0x5e0] sm:$0xff] }
  0x99   : > { %1285 = vmatprep.subr.bf16.mxu1 %v1284_v61  ;;  %v447_v61 = vld [vmem:[%s1783_s29 + $0x568] sm:$0xff]  ;;  %v1188_v33 = vpack.c.bf16 %v463_v27, %v459_v26  ;;  %v460_v36 = vld [vmem:[%s1783_s29 + $0x5d0] sm:$0xff]  ;;  %v470_v47 = vld [vmem:[%s1783_s29 + $0x620] sm:$0xff] }
  0x9a   : > { %v1180_v6 = vpack.c.bf16 %v447_v61, %v443_v59  ;;  %v464_v38 = vld [vmem:[%s1783_s29 + $0x5f0] sm:$0xff]  ;;  %v467_v39 = vld [vmem:[%s1783_s29 + $0x608] sm:$0xff]  ;;  %v477_v53 = vld [vmem:[%s1783_s29 + $0x658] sm:$0xff] }
  0x9b   : > { %1159 = vmatpush1.bf16.msra.mxu0 %v1158_v3  ;;  %v442_v3 = vld [vmem:[%s1783_s29 + $0x540] sm:$0xff]  ;;  %v1318_v44 = vpack.c.bf16 %v464_v38, %v460_v36  ;;  %v468_v48 = vld [vmem:[%s1783_s29 + $0x610] sm:$0xff]  ;;  %v475_v51 = vld [vmem:[%s1783_s29 + $0x648] sm:$0xff] }
  0x9c   : > { %1287 = vmatpush1.bf16.msra.mxu1 %v1286_v4  ;;  %1161 = vmatprep.subr.bf16.mxu0 %v1160_v5  ;;  %v446_v4 = vld [vmem:[%s1783_s29 + $0x560] sm:$0xff]  ;;  %v1306_v5 = vpack.c.bf16 %v440_v58, %v436_v57  ;;  %v472_v50 = vld [vmem:[%s1783_s29 + $0x630] sm:$0xff]  ;;  %v481_v54 = vld [vmem:[%s1783_s29 + $0x678] sm:$0xff] }
  0x9d   : > { %1289 = vmatprep.subr.bf16.mxu1 %v1288_v9  ;;  %v266_v9 = vld [vmem:[#allocation3 + $0x40] sm:$0xff]  ;;  %v1324_v61 = vpack.c.bf16 %v481_v54, %v477_v53  ;;  %v487_v0 = vld [vmem:[%s1783_s29 + $0x6a8] sm:$0xff]  ;;  %v485_v1 = vld [vmem:[%s1783_s29 + $0x698] sm:$0xff] }
  0x9e   : > { %595 = vmatmul.mubr.f32.vlgmr.msra.gmra.mrb[0].mxu0 %v258_v15  ;;  %v474_v58 = vld [vmem:[%s1783_s29 + $0x640] sm:$0xff]  ;;  %v491_v11 = vld [vmem:[%s1783_s29 + $0x6c8] sm:$0xff]  ;;  %v493_v13 = vld [vmem:[%s1783_s29 + $0x6d8] sm:$0xff] }
  0x9f   : > { %1163 = vmatpush1.bf16.msra.mxu0 %v1162_v16  ;;  %773 = vmatmul.mubr.f32.vlgmr.msra.gmra.mrb[0].mxu1 %v258_v15  ;;  %v457_v15 = vld [vmem:[%s1783_s29 + $0x5b8] sm:$0xff]  ;;  %v1182_v16 = vpack.c.bf16 %v446_v4, %v442_v3  ;;  %v478_v59 = vld [vmem:[%s1783_s29 + $0x660] sm:$0xff]  ;;  %v495_v12 = vld [vmem:[%s1783_s29 + $0x6e8] sm:$0xff] }
  0xa0   : > { %1291 = vmatpush1.bf16.msra.mxu1 %v1290_v17  ;;  %1165 = vmatprep.subr.bf16.mxu0 %v1164_v18  ;;  %v450_v17 = vld [vmem:[%s1783_s29 + $0x580] sm:$0xff]  ;;  %v271_v18 = vld [vmem:[#allocation3 + $0x68] sm:$0xff]  ;;  %v1312_v24 = vpack.c.bf16 %v457_v15, %v453_v14  ;;  %v1198_v3 = vpack.c.bf16 %v478_v59, %v474_v58  ;;  %v497_v14 = vld [vmem:[%s1783_s29 + $0x6f8] sm:$0xff] }
  0xa1   : > { %1293 = vmatprep.subr.bf16.mxu1 %v1292_v22  ;;  %600 = vmatprep.mubr.f32.mxu0 %v263_v62  ;;  %v452_v22 = vld [vmem:[%s1783_s29 + $0x590] sm:$0xff]  ;;  %v486_v7 = vld [vmem:[%s1783_s29 + $0x6a0] sm:$0xff]  ;;  %v505_v26 = vld [vmem:[%s1783_s29 + $0x738] sm:$0xff] }
  0xa2   : > { %778 = vmatprep.mubr.f32.mxu1 %v263_v62  ;;  %601 = vmatmul.mubr.f32.gmra.mrb[2].mxu0 %v262_v63  ;;  %v1314_v32 = vpack.c.bf16 %v456_v25, %v452_v22  ;;  %v480_v62 = vld [vmem:[%s1783_s29 + $0x670] sm:$0xff]  ;;  %v501_v25 = vld [vmem:[%s1783_s29 + $0x718] sm:$0xff]  ;;  %v511_v36 = vld [vmem:[%s1783_s29 + $0x768] sm:$0xff] }
  0xa3   : > { %1167 = vmatpush1.bf16.msra.mxu0 %v1166_v28  ;;  %779 = vmatmul.mubr.f32.gmra.mrb[2].mxu1 %v262_v63  ;;  %v461_v28 = vld [vmem:[%s1783_s29 + $0x5d8] sm:$0xff]  ;;  %v483_v63 = vld [vmem:[%s1783_s29 + $0x688] sm:$0xff]  ;;  %v496_v22 = vld [vmem:[%s1783_s29 + $0x6f0] sm:$0xff] }
  0xa4   : > { %1295 = vmatpush1.bf16.msra.mxu1 %v1294_v29  ;;  %1169 = vmatprep.subr.bf16.mxu0 %v1168_v30  ;;  %v465_v29 = vld [vmem:[%s1783_s29 + $0x5f8] sm:$0xff]  ;;  %v1186_v30 = vpack.c.bf16 %v454_v21, %v450_v17  ;;  %v1204_v17 = vpack.c.bf16 %v495_v12, %v491_v11  ;;  %v1332_v21 = vpack.c.bf16 %v497_v14, %v493_v13  ;;  %v514_v54 = vld [vmem:[%s1783_s29 + $0x780] sm:$0xff]  ;;  %v520_v58 = vld [vmem:[%s1783_s29 + $0x7b0] sm:$0xff] }
  0xa5   : > { %1297 = vmatprep.subr.bf16.mxu1 %v1296_v34  ;;  %606 = vmatprep.mubr.f32.mxu0 %v267_v8  ;;  %v458_v34 = vld [vmem:[%s1783_s29 + $0x5c0] sm:$0xff]  ;;  %v1316_v37 = vpack.c.bf16 %v465_v29, %v461_v28  ;;  %v513_v38 = vld [vmem:[%s1783_s29 + $0x778] sm:$0xff]  ;;  %v523_v59 = vld [vmem:[%s1783_s29 + $0x7c8] sm:$0xff] }
  0xa6   : > { %784 = vmatprep.mubr.f32.mxu1 %v267_v8  ;;  %607 = vmatmul.mubr.f32.gmra.mrb[4].mxu0 %v266_v9  ;;  %v1190_v43 = vpack.c.bf16 %v462_v35, %v458_v34  ;;  %v484_v8 = vld [vmem:[%s1783_s29 + $0x690] sm:$0xff]  ;;  %v507_v35 = vld [vmem:[%s1783_s29 + $0x748] sm:$0xff]  ;;  %v269_v12 = vld [vmem:[#allocation3 + $0x58] sm:$0xff] }
  0xa7   : > { %1171 = vmatpush1.bf16.msra.mxu0 %v1170_v40  ;;  %785 = vmatmul.mubr.f32.gmra.mrb[4].mxu1 %v266_v9  ;;  %v471_v40 = vld [vmem:[%s1783_s29 + $0x628] sm:$0xff]  ;;  %v504_v34 = vld [vmem:[%s1783_s29 + $0x730] sm:$0xff]  ;;  %v273_v14 = vld [vmem:[#allocation3 + $0x78] sm:$0xff] }
  0xa8   : > { %1299 = vmatpush1.bf16.msra.mxu1 %v1298_v41  ;;  %1173 = vmatprep.subr.bf16.mxu0 %v1172_v42  ;;  %v469_v41 = vld [vmem:[%s1783_s29 + $0x618] sm:$0xff]  ;;  %v1192_v45 = vpack.c.bf16 %v471_v40, %v467_v39  ;;  %v264_v11 = vld [vmem:[#allocation3 + $0x30] sm:$0xff] }
  0xa9   : > { %1301 = vmatprep.subr.bf16.mxu1 %v1300_v46  ;;  %612 = vmatprep.mubr.f32.mxu0 %v271_v18  ;;  %v473_v42 = vld [vmem:[%s1783_s29 + $0x638] sm:$0xff]  ;;  %v466_v46 = vld [vmem:[%s1783_s29 + $0x600] sm:$0xff]  ;;  %v268_v13 = vld [vmem:[#allocation3 + $0x50] sm:$0xff] }
  0xaa   : > { %790 = vmatprep.mubr.f32.mxu1 %v271_v18  ;;  %613 = vmatmul.mubr.f32.gmra.mrb[6].mxu0 %v270_v23  ;;  %v1320_v49 = vpack.c.bf16 %v473_v42, %v469_v41  ;;  %v490_v18 = vld [vmem:[%s1783_s29 + $0x6c0] sm:$0xff]  ;;  %v1212_v41 = vpack.c.bf16 %v511_v36, %v507_v35 }
  0xab   : > { %1175 = vmatpush1.bf16.msra.mxu0 %v1174_v52  ;;  %791 = vmatmul.mubr.f32.gmra.mrb[6].mxu1 %v270_v23  ;;  %v479_v52 = vld [vmem:[%s1783_s29 + $0x668] sm:$0xff]  ;;  %v506_v42 = vld [vmem:[%s1783_s29 + $0x740] sm:$0xff] }
  0xac   : > { %1303 = vmatpush1.bf16.msra.mxu1 %v1302_v55  ;;  %1177 = vmatprep.subr.bf16.mxu0 %v1176_v56  ;;  %v1194_v55 = vpack.c.bf16 %v470_v47, %v466_v46  ;;  %v1322_v56 = vpack.c.bf16 %v472_v50, %v468_v48  ;;  %v1196_v57 = vpack.c.bf16 %v479_v52, %v475_v51  ;;  %v499_v23 = vld [vmem:[%s1783_s29 + $0x708] sm:$0xff]  ;;  %v512_v46 = vld [vmem:[%s1783_s29 + $0x770] sm:$0xff]  ;;  %v521_v50 = vld [vmem:[%s1783_s29 + $0x7b8] sm:$0xff] }
  0xad   : > { %1305 = vmatprep.subr.bf16.mxu1 %v1304_v60  ;;  %683 = vmatprep.mubr.f32.mxu0 %v261_v31  ;;  %v476_v60 = vld [vmem:[%s1783_s29 + $0x650] sm:$0xff]  ;;  %v515_v47 = vld [vmem:[%s1783_s29 + $0x788] sm:$0xff] }
  0xae   : > { %861 = vmatprep.mubr.f32.mxu1 %v261_v31  ;;  %v1326_v4 = vpack.c.bf16 %v480_v62, %v476_v60  ;;  %v502_v31 = vld [vmem:[%s1783_s29 + $0x720] sm:$0xff]  ;;  %v519_v48 = vld [vmem:[%s1783_s29 + $0x7a8] sm:$0xff]  ;;  %v529_v62 = vld [vmem:[%s1783_s29 + $0x7f8] sm:$0xff] }
  0xaf   : > { %1179 = vmatpush1.bf16.msra.mxu0 %v1178_v2  ;;  %v489_v2 = vld [vmem:[%s1783_s29 + $0x6b8] sm:$0xff]  ;;  %v1216_v53 = vpack.c.bf16 %v519_v48, %v515_v47  ;;  %v527_v60 = vld [vmem:[%s1783_s29 + $0x7e8] sm:$0xff] }
  0xb0   : > { %1307 = vmatpush1.bf16.msra.mxu1 %v1306_v5  ;;  %1181 = vmatprep.subr.bf16.mxu0 %v1180_v6  ;;  %v1200_v5 = vpack.c.bf16 %v487_v0, %v483_v63  ;;  %v482_v6 = vld [vmem:[%s1783_s29 + $0x680] sm:$0xff]  ;;  %v1328_v9 = vpack.c.bf16 %v489_v2, %v485_v1  ;;  %v1220_v1 = vpack.c.bf16 %v527_v60, %v523_v59 }
  0xb1   : > { %1309 = vmatprep.subr.bf16.mxu1 %v1308_v10  ;;  %v488_v10 = vld [vmem:[%s1783_s29 + $0x6b0] sm:$0xff]  ;;  %v1202_v15 = vpack.c.bf16 %v486_v7, %v482_v6  ;;  %v522_v2 = vld [vmem:[%s1783_s29 + $0x7c0] sm:$0xff] }
  0xb2   : > { %v528_v6 = vld [vmem:[%s1783_s29 + $0x7f0] sm:$0xff] }
  0xb3   : > { %1183 = vmatpush1.bf16.msra.mxu0 %v1182_v16  ;;  %v1330_v16 = vpack.c.bf16 %v488_v10, %v484_v8  ;;  %v265_v10 = vld [vmem:[#allocation3 + $0x38] sm:$0xff] }
  0xb4   : > { %1311 = vmatpush1.bf16.msra.mxu1 %v1310_v19  ;;  %1185 = vmatprep.subr.bf16.mxu0 %v1184_v20  ;;  %v494_v19 = vld [vmem:[%s1783_s29 + $0x6e0] sm:$0xff]  ;;  %v492_v20 = vld [vmem:[%s1783_s29 + $0x6d0] sm:$0xff] }
  0xb5   : > { %1313 = vmatprep.subr.bf16.mxu1 %v1312_v24  ;;  %v503_v24 = vld [vmem:[%s1783_s29 + $0x728] sm:$0xff]  ;;  %v1206_v27 = vpack.c.bf16 %v494_v19, %v490_v18  ;;  %v1334_v28 = vpack.c.bf16 %v496_v22, %v492_v20 }
  0xb6   : > { %v1208_v29 = vpack.c.bf16 %v503_v24, %v499_v23 }
  0xb7   : > { %1187 = vmatpush1.bf16.msra.mxu0 %v1186_v30  ;;  %v498_v30 = vld [vmem:[%s1783_s29 + $0x700] sm:$0xff] }
  0xb8   : > { %1315 = vmatpush1.bf16.msra.mxu1 %v1314_v32  ;;  %1189 = vmatprep.subr.bf16.mxu0 %v1188_v33  ;;  %v500_v32 = vld [vmem:[%s1783_s29 + $0x710] sm:$0xff]  ;;  %v1336_v33 = vpack.c.bf16 %v505_v26, %v501_v25  ;;  %v1210_v39 = vpack.c.bf16 %v502_v31, %v498_v30 }
  0xb9   : > { %1317 = vmatprep.subr.bf16.mxu1 %v1316_v37  ;;  %v509_v37 = vld [vmem:[%s1783_s29 + $0x758] sm:$0xff]  ;;  %v1338_v40 = vpack.c.bf16 %v504_v34, %v500_v32 }
  0xbb   : > { %1191 = vmatpush1.bf16.msra.mxu0 %v1190_v43  ;;  %v510_v43 = vld [vmem:[%s1783_s29 + $0x760] sm:$0xff] }
  0xbc   : > { %1319 = vmatpush1.bf16.msra.mxu1 %v1318_v44  ;;  %1193 = vmatprep.subr.bf16.mxu0 %v1192_v45  ;;  %v508_v44 = vld [vmem:[%s1783_s29 + $0x750] sm:$0xff]  ;;  %v1340_v45 = vpack.c.bf16 %v513_v38, %v509_v37  ;;  %v1214_v51 = vpack.c.bf16 %v510_v43, %v506_v42 }
  0xbd   : > { %1321 = vmatprep.subr.bf16.mxu1 %v1320_v49  ;;  %v517_v49 = vld [vmem:[%s1783_s29 + $0x798] sm:$0xff]  ;;  %v1342_v52 = vpack.c.bf16 %v512_v46, %v508_v44 }
  0xbf   : > { %1195 = vmatpush1.bf16.msra.mxu0 %v1194_v55  ;;  %v518_v55 = vld [vmem:[%s1783_s29 + $0x7a0] sm:$0xff] }
  0xc0   : > { %1323 = vmatpush1.bf16.msra.mxu1 %v1322_v56  ;;  %1197 = vmatprep.subr.bf16.mxu0 %v1196_v57  ;;  %v516_v56 = vld [vmem:[%s1783_s29 + $0x790] sm:$0xff]  ;;  %v1344_v57 = vpack.c.bf16 %v521_v50, %v517_v49  ;;  %v1218_v63 = vpack.c.bf16 %v518_v55, %v514_v54 }
  0xc1   : > { %1325 = vmatprep.subr.bf16.mxu1 %v1324_v61  ;;  %v525_v61 = vld [vmem:[%s1783_s29 + $0x7d8] sm:$0xff]  ;;  %v1346_v0 = vpack.c.bf16 %v520_v58, %v516_v56 }
  0xc3   : > { %1199 = vmatpush1.bf16.msra.mxu0 %v1198_v3  ;;  %v526_v3 = vld [vmem:[%s1783_s29 + $0x7e0] sm:$0xff] }
  0xc4   : > { %1327 = vmatpush1.bf16.msra.mxu1 %v1326_v4  ;;  %1201 = vmatprep.subr.bf16.mxu0 %v1200_v5  ;;  %v1348_v4 = vpack.c.bf16 %v529_v62, %v525_v61  ;;  %v524_v5 = vld [vmem:[%s1783_s29 + $0x7d0] sm:$0xff]  ;;  %v1222_v7 = vpack.c.bf16 %v526_v3, %v522_v2 }
  0xc5   : > { %1329 = vmatprep.subr.bf16.mxu1 %v1328_v9  ;;  %v1350_v8 = vpack.c.bf16 %v528_v6, %v524_v5  ;;  %v260_v9 = vld [vmem:[#allocation3 + $0x10] sm:$0xff] }
  0xc7   : > { %1203 = vmatpush1.bf16.msra.mxu0 %v1202_v15  ;;  %v272_v15 = vld [vmem:[#allocation3 + $0x70] sm:$0xff] }
  0xc8   : > { %1331 = vmatpush1.bf16.msra.mxu1 %v1330_v16  ;;  %1205 = vmatprep.subr.bf16.mxu0 %v1204_v17 }
  0xc9   : > { %1333 = vmatprep.subr.bf16.mxu1 %v1332_v21 }
  0xcb   : > { %1207 = vmatpush1.bf16.msra.mxu0 %v1206_v27 }
  0xcc   : > { %1335 = vmatpush1.bf16.msra.mxu1 %v1334_v28  ;;  %1209 = vmatprep.subr.bf16.mxu0 %v1208_v29 }
  0xcd   : > { %1337 = vmatprep.subr.bf16.mxu1 %v1336_v33 }
  0xcf   : > { %1211 = vmatpush1.bf16.msra.mxu0 %v1210_v39 }
  0xd0   : > { %1339 = vmatpush1.bf16.msra.mxu1 %v1338_v40  ;;  %1213 = vmatprep.subr.bf16.mxu0 %v1212_v41 }
  0xd1   : > { %1341 = vmatprep.subr.bf16.mxu1 %v1340_v45 }
  0xd3   : > { %1215 = vmatpush1.bf16.msra.mxu0 %v1214_v51 }
  0xd4   : > { %1343 = vmatpush1.bf16.msra.mxu1 %v1342_v52  ;;  %1217 = vmatprep.subr.bf16.mxu0 %v1216_v53 }
  0xd5   : > { %1345 = vmatprep.subr.bf16.mxu1 %v1344_v57 }
  0xd7   : > { %1219 = vmatpush1.bf16.msra.mxu0 %v1218_v63 }
  0xd8   : > { %1347 = vmatpush1.bf16.msra.mxu1 %v1346_v0  ;;  %1221 = vmatprep.subr.bf16.mxu0 %v1220_v1 }
  0xd9   : > { %1349 = vmatprep.subr.bf16.mxu1 %v1348_v4 }
  0xdb   : > { %1223 = vmatpush1.bf16.msra.mxu0 %v1222_v7 }
  0xdc   : > { %1351 = vmatpush1.bf16.msra.mxu1 %v1350_v8 }
  0xde   : > { %684 = vmatmul.mubr.f32.vlgmr.msra.gmra.mrb[0].mxu0 %v260_v9 }
  0xdf   : > { %862 = vmatmul.mubr.f32.vlgmr.msra.gmra.mrb[0].mxu1 %v260_v9  ;;  %689 = vmatprep.mubr.f32.mxu0 %v265_v10 }
  0xe0   : > { %867 = vmatprep.mubr.f32.mxu1 %v265_v10 }
  0xe2   : > { %690 = vmatmul.mubr.f32.gmra.mrb[2].mxu0 %v264_v11 }
  0xe3   : > { %868 = vmatmul.mubr.f32.gmra.mrb[2].mxu1 %v264_v11  ;;  %695 = vmatprep.mubr.f32.mxu0 %v269_v12 }
  0xe4   : > { %873 = vmatprep.mubr.f32.mxu1 %v269_v12 }
  0xe6   : > { %696 = vmatmul.mubr.f32.gmra.mrb[4].mxu0 %v268_v13 }
  0xe7   : > { %874 = vmatmul.mubr.f32.gmra.mrb[4].mxu1 %v268_v13  ;;  %701 = vmatprep.mubr.f32.mxu0 %v273_v14 }
  0xe8   : > { %879 = vmatprep.mubr.f32.mxu1 %v273_v14 }
  0xea   : > { %702 = vmatmul.mubr.f32.gmra.mrb[6].mxu0 %v272_v15 }
  0xeb   : > { %880 = vmatmul.mubr.f32.gmra.mrb[6].mxu1 %v272_v15 }
 0x1b1   : > { %v685_v16 = vpop.f32.mrb[0].mxu0 }
 0x1b2   : > { %937 = vst [vmem:[%s2046_s19] sm:$0xff] %v685_v16  ;;  %v863_v17 = vpop.f32.mrb[0].mxu1  ;;  %v687_v18 = vpop.f32.mrb[1].mxu0 }
 0x1b3   : > { %939 = vst [vmem:[%s2046_s19 + $0x10] sm:$0xff] %v863_v17  ;;  %938 = vst [vmem:[%s2046_s19 + $0x8] sm:$0xff] %v687_v18  ;;  %v865_v19 = vpop.f32.mrb[1].mxu1 }
 0x1b4   : > { %940 = vst [vmem:[%s2046_s19 + $0x18] sm:$0xff] %v865_v19 }
 0x1b5   : > { %v691_v20 = vpop.f32.mrb[2].mxu0 }
 0x1b6   : > { %941 = vst [vmem:[%s2046_s19 + $0x20] sm:$0xff] %v691_v20  ;;  %v869_v21 = vpop.f32.mrb[2].mxu1  ;;  %v693_v22 = vpop.f32.mrb[3].mxu0 }
 0x1b7   : > { %943 = vst [vmem:[%s2046_s19 + $0x30] sm:$0xff] %v869_v21  ;;  %942 = vst [vmem:[%s2046_s19 + $0x28] sm:$0xff] %v693_v22  ;;  %v871_v23 = vpop.f32.mrb[3].mxu1 }
 0x1b8   : > { %944 = vst [vmem:[%s2046_s19 + $0x38] sm:$0xff] %v871_v23 }
 0x1b9   : > { %v697_v24 = vpop.f32.mrb[4].mxu0 }
 0x1ba   : > { %945 = vst [vmem:[%s2046_s19 + $0x40] sm:$0xff] %v697_v24  ;;  %v875_v25 = vpop.f32.mrb[4].mxu1  ;;  %v699_v26 = vpop.f32.mrb[5].mxu0 }
 0x1bb   : > { %947 = vst [vmem:[%s2046_s19 + $0x50] sm:$0xff] %v875_v25  ;;  %946 = vst [vmem:[%s2046_s19 + $0x48] sm:$0xff] %v699_v26  ;;  %v877_v27 = vpop.f32.mrb[5].mxu1 }
 0x1bc   : > { %948 = vst [vmem:[%s2046_s19 + $0x58] sm:$0xff] %v877_v27 }
 0x1bd   : > { %v703_v28 = vpop.f32.mrb[6].mxu0 }
 0x1be   : > { %949 = vst [vmem:[%s2046_s19 + $0x60] sm:$0xff] %v703_v28  ;;  %v881_v29 = vpop.f32.mrb[6].mxu1  ;;  %v705_v30 = vpop.f32.mrb[7].mxu0 }
 0x1bf   : > { %951 = vst [vmem:[%s2046_s19 + $0x70] sm:$0xff] %v881_v29  ;;  %950 = vst [vmem:[%s2046_s19 + $0x68] sm:$0xff] %v705_v30  ;;  %v883_v31 = vpop.f32.mrb[7].mxu1 }
 0x1c0   : > { %952 = vst [vmem:[%s2046_s19 + $0x78] sm:$0xff] %v883_v31 }
 0x1c1   : > { %1518 = shalt.err (!%p1515_p8)
}
 0x1c2   : > { %s1519_s24 = scalar_lea.hbm %s2065_s6, 2048  ;;  %s1523_s26 = scalar_lea.hbm %s2122_s2, 4096 }
 0x1c3   : > { %p1520_p0 = scmp.ne.s32.totalorder %s2065_s6, %s1519_s24  ;;  %p1524_p12 = scmp.lt.u32.totalorder %s2065_s6, %s2122_s2 }
 0x1c4   : > { %p1525_p5 = scmp.lt.u32.totalorder %s1523_s26, %s1519_s24  ;;  %p1527_p9 = scmp.lt.u32.totalorder %s1519_s24, %s2065_s6 }
 0x1c5   : > { %p1521_p2 = pnand %p1520_p0, %p2141_p11 }
 0x1c6   : > { %p1526_p10 = por %p1525_p5, %p1524_p12 }
 0x1c7   : > { %p1522_p7 = pneg %p1521_p2 }
 0x1c8   : > { %p1528_p13 = por %p1527_p9, %p1526_p10 }
 0x1ca   : > { %p1529_p4 = pnand %p1528_p13, %p1522_p7 }
 0x1cc   : > { %1532 = shalt.err (!%p1529_p4)
}
 0x1cd   : > { %s1599_s17 = smov 512   ;;  %s1600_s19 = smov 1024  }
 0x1ce   : > { %s1601_s22 = smov 32  }
 0x1cf   : > { %1374 = dma.vmem_to_hbm [thread:$0]  (%p2141_p11), %s2067_s8, 2048, %s2065_s6, %s954_s12, %s1599_s17, %s1600_s19, %s1601_s22  }
 0x1d0 PF: > { %s985_s15 = sand.u32 1, %s1571_s9   ;;  %p2142_p1 = scmp.ne.s32.totalorder %s2133_s21, 0 }
 0x1d1   : > { %p2143_p3 = scmp.ge.s32.totalorder %s1591_s14, 2  ;;  %s986_s5 = scalar_lea.sflag [#allocation5], %s985_s15 }
 0x1d3   : > { %p1385_p6 = pnand %p2143_p3, %p2142_p1 }
 0x1d5   : > { %1566 = dma.done.wait (!%p1385_p6), %s986_s5, 2048  }
 0x1d6   : > { %1568 = vsyncadd (!%p1385_p6), %s986_s5, 4294965248  ;;  %s19_s14 = sadd.s32 1, %s1591_s14   ;;  %s2144_s9 = smov %s1575_s10 }
 0x1d7   : > { %p16_p8 = scmp.ge.s32.totalorder %s19_s14, 4   ;;  %s2145_s10 = smov %s1579_s11 }
 0x1d8   : > { %s2146_s11 = smov %s1738_s7  ;;  %s2147_s12 = smov %s1587_s13 }
 0x1d9   : > { %s2148_s13 = smov %s2150_s27  ;;  %18 = sbr.rel (!%p16_p8) target bundleno = 7 (0x7), region = 87 }
 0x1e0   :  { %991 = vsyncpa [#allocation4], 1 }
 0x1e1   :  { %993 = vsyncpa [#allocation4 + $0x1], 1 }
 0x1e2   :  { %994 = vsyncpa [#allocation7], 1 }
 0x1e3   :  { %996 = vsyncpa [#allocation7 + $0x1], 1 }
 0x1e4   :  { %997 = vsyncpa [#allocation5], 1 }
 0x1e5   :  { %999 = vsyncpa [#allocation5 + $0x1], 1 }

</bundles_post_ra>
